<compile_context>
chip_gen: v5e
topology: v5e:2x2
jax: 0.10.0
libtpu: 0.0.40
codegen_flags: <defaults>
</compile_context>

<pallas_src>
import functools
import math

import jax
import jax.numpy as jnp
from jax.experimental import pallas as pl
from jax.experimental.pallas import tpu as pltpu

_SUB = 8  # sublane quantum


def _round_up(a: int, b: int) -> int:
    return ((a + b - 1) // b) * b


def _cdiv(a: int, b: int) -> int:
    return -(-a // b)


def _slice_axis(v, axis, start, length):
    starts = [0] * v.ndim
    limits = list(v.shape)
    starts[axis] = start
    limits[axis] = start + length
    return jax.lax.slice(v, starts, limits)


def _sliding_reduce(x, win, axis, comb):
    """out[..., i, ...] = reduce(x[..., i:i+win, ...]) along `axis`, stride 1.

    Log-depth shift-and-reduce.  The binary-decomposition segments are disjoint,
    so it is exact for both max and sum, and it breaks the serial dependency
    chain of a linear accumulate.
    """
    n = x.shape[axis]
    out_len = n - win + 1
    pows = [(1, x)]            # (window size, partial reduction over that window)
    w, s = 1, x
    while 2 * w <= win:
        s = comb(_slice_axis(s, axis, 0, s.shape[axis] - w),
                 _slice_axis(s, axis, w, s.shape[axis] - w))
        w *= 2
        pows.append((w, s))
    res, offset = None, 0
    for w, s in reversed(pows):
        if win & w:
            piece = _slice_axis(s, axis, offset, out_len)
            res = piece if res is None else comb(res, piece)
            offset += w
    return res


def _pool_kernel(x_ref, halo_ref, o_ref, edge_ref, *,
                 p_h, p_w, mode, acc_dtype, inv_area):
    tile_oh = x_ref.shape[0]
    hr = halo_ref.shape[0]                     # halo_rows (multiple of 8, >= p_h-1)
    main_rows = tile_oh - (p_h - 1)            # rows computable from x_ref alone
    comb = jnp.maximum if mode == "max" else jnp.add

    def pool(v):
        # Separable reduction: rows (sublanes) first, then columns (lanes).
        r = _sliding_reduce(v.astype(acc_dtype), p_h, axis=0, comb=comb)
        c = _sliding_reduce(r, p_w, axis=1, comb=comb)
        if mode == "avg":
            c = c * inv_area
        return c.astype(o_ref.dtype)

    # Main body of the tile: pooled directly from the input block (no stitch).
    if main_rows > 0:
        o_ref[pl.ds(0, main_rows), :] = pool(x_ref[...])

    # Boundary rows: tiny, aligned stitch of the tile tail with the row halo.
    if p_h > 1:
        edge_ref[pl.ds(0, hr), :] = x_ref[pl.ds(tile_oh - hr, hr), :]
        edge_ref[pl.ds(hr, hr), :] = halo_ref[...]
        ce = pool(edge_ref[...])               # (2*hr - p_h + 1, ow)
        # Overlapping rows duplicate main-part values exactly; stores stay 8-aligned.
        o_ref[pl.ds(tile_oh - hr, hr), :] = ce[0:hr, :]


def _vmem_config():
    """Generation-aware (budget_for_blocks, vmem_limit) in bytes."""
    cap = 64 * 1024 * 1024                     # conservative default (v7x per-TC)
    try:
        info = pltpu.get_tpu_info()
        cap = int(getattr(info, "vmem_capacity_bytes", cap) or cap)
    except Exception:
        pass
    limit = min((cap * 3) // 4, 64 * 1024 * 1024)     # 64 MiB on v5e/v6e, 48 MiB on v7x
    budget = min(limit // 3, 24 * 1024 * 1024)        # block buffers; rest is temp headroom
    return budget, limit


def pooling2d(x, pooling_size, mode="avg", *, max_tile_oh=512):
    """JAX/Pallas equivalent of Pooling2d.forward for a 2-D input matrix."""
    if mode not in ("max", "avg"):
        raise ValueError(f"mode must be 'max' or 'avg', got {mode!r}")
    p_h, p_w = int(pooling_size[0]), int(pooling_size[1])
    h, w = x.shape
    oh, ow = h - p_h + 1, w - p_w + 1
    if oh <= 0 or ow <= 0:
        raise ValueError("pooling window larger than input matrix")

    out_dtype = jnp.float32                    # torch.zeros(...) default dtype
    # max is exact in the input dtype (keeps bf16 narrow); avg accumulates in f32.
    acc_dtype = x.dtype if mode == "max" else jnp.float32

    halo_rows = _round_up(max(p_h - 1, 1), _SUB)

    budget, vmem_limit = _vmem_config()
    in_item = jnp.dtype(x.dtype).itemsize
    acc_item = jnp.dtype(acc_dtype).itemsize
    out_item = jnp.dtype(out_dtype).itemsize
    # Fixed per-tile VMEM: double-buffered halo blocks + edge stitch scratch.
    fixed = 4 * halo_rows * w * in_item
    # Per-output-row VMEM: double-buffered in/out blocks + ~4 combine-tree temps.
    per_row = 2 * w * in_item + 2 * ow * out_item + 4 * w * acc_item
    budget_rows = max((budget - fixed) // max(per_row, 1), halo_rows)

    tile_oh = min(int(budget_rows), int(max_tile_oh),
                  _round_up(oh, halo_rows),                    # no point exceeding oh
                  _round_up(_cdiv(oh, 2), halo_rows))          # nt>=2 -> both v7x cores busy
    tile_oh = max((tile_oh // halo_rows) * halo_rows, halo_rows)
    nt = _cdiv(oh, tile_oh)

    mult = tile_oh // halo_rows                # halo blocks per row tile (exact)
    max_halo_idx = (h - 1) // halo_rows        # keep last-tile halo DMA in bounds

    kernel = functools.partial(
        _pool_kernel, p_h=p_h, p_w=p_w, mode=mode,
        acc_dtype=acc_dtype, inv_area=1.0 / float(p_h * p_w))

    cost = pl.CostEstimate(
        flops=int(oh) * int(ow) * (max(p_h - 1, 1) + max(p_w - 1, 1)),
        transcendentals=0,
        bytes_accessed=int(h * w * in_item + oh * ow * out_item
                           + nt * halo_rows * w * in_item))

    out = pl.pallas_call(
        kernel,
        out_shape=jax.ShapeDtypeStruct((oh, ow), out_dtype),
        grid=(nt,),
        in_specs=[
            # Main row tile: full (un-padded) array width == full dim -> legal.
            pl.BlockSpec((tile_oh, w), lambda i: (i, 0)),
            # Small row halo: first halo_rows rows after the tile, from the same array.
            pl.BlockSpec((halo_rows, w),
                         lambda i: (jnp.minimum((i + 1) * mult, max_halo_idx), 0)),
        ],
        out_specs=pl.BlockSpec((tile_oh, ow), lambda i: (i, 0)),
        scratch_shapes=[pltpu.VMEM((2 * halo_rows, w), x.dtype)],
        compiler_params=pltpu.CompilerParams(
            dimension_semantics=("parallel",),        # megacore-shardable on v7x
            vmem_limit_bytes=int(vmem_limit)),
        cost_estimate=cost,
    )(x, x)
    return out


def _reference(x, pooling_size, mode):
    """Pure-JAX reference of the intended stride-1 valid pooling."""
    p_h, p_w = pooling_size
    if mode == "max":
        r = jax.lax.reduce_window(x, -jnp.inf, jax.lax.max,
                                  (p_h, p_w), (1, 1), "VALID")
        return r.astype(jnp.float32)
    s = jax.lax.reduce_window(x.astype(jnp.float32), 0.0, jax.lax.add,
                              (p_h, p_w), (1, 1), "VALID")
    return s / float(p_h * p_w)


if __name__ == "__main__":
    key = jax.random.PRNGKey(0)
    k1, k2, k3 = jax.random.split(key, 3)
    ok = True

    cases = [
        # Square input matching the reference module's usual usage.
        (jax.random.normal(k1, (16, 16), dtype=jnp.float32), (2, 2), {}),
        # Multi-tile grid (forced small row tile), 3x3 window: exercises the
        # halo stream, the boundary stitch and the partial last row tile.
        (jax.random.normal(k2, (64, 40), dtype=jnp.float32), (3, 3),
         dict(max_tile_oh=16)),
        # Ragged everything: non-multiple-of-8 height, odd width, rectangular window.
        (jax.random.normal(k3, (13, 21), dtype=jnp.float32), (3, 4), {}),
    ]

    for xin, psize, kw in cases:
        for mode in ("avg", "max"):
            out = jax.block_until_ready(pooling2d(xin, psize, mode=mode, **kw))
            ref = _reference(xin, psize, mode)
            ok &= out.shape == ref.shape
            ok &= bool(jnp.allclose(out, ref, atol=1e-5, rtol=1e-5))

    if ok:
        print("KERNEL_OK")
</pallas_src>

<mosaic_0001>
module attributes {stable_mosaic.version = 11 : i64} {
  func.func @_pool_kernel(%arg0: i32, %arg1: memref<8x16xf32, #tpu.memory_space<vmem>>, %arg2: memref<8x16xf32, #tpu.memory_space<vmem>>, %arg3: memref<8x15xf32, #tpu.memory_space<vmem>>, %arg4: memref<16x16xf32, #tpu.memory_space<vmem>>) attributes {dimension_semantics = [#tpu.dimension_semantics<parallel>], iteration_bounds = array<i64: 2>, scalar_prefetch = 0 : i64, scratch_operands = 1 : i64, tpu.core_type = #tpu.core_type<tc>, window_params = [{transform_indices = @transform_0, window_bounds = array<i64: 8, 16>}, {transform_indices = @transform_1, window_bounds = array<i64: 8, 16>}, {transform_indices = @transform_2, window_bounds = array<i64: 8, 15>}]} {
    %c0 = arith.constant 0 : index
    %c0_0 = arith.constant 0 : index
    %0 = vector.load %arg1[%c0, %c0_0] : memref<8x16xf32, #tpu.memory_space<vmem>>, vector<8x16xf32>
    %1 = vector.extract_strided_slice %0 {offsets = [0, 0], sizes = [7, 16], strides = [1, 1]} : vector<8x16xf32> to vector<7x16xf32>
    %2 = vector.extract_strided_slice %0 {offsets = [1, 0], sizes = [7, 16], strides = [1, 1]} : vector<8x16xf32> to vector<7x16xf32>
    %3 = arith.addf %1, %2 : vector<7x16xf32>
    %4 = vector.extract_strided_slice %3 {offsets = [0, 0], sizes = [7, 16], strides = [1, 1]} : vector<7x16xf32> to vector<7x16xf32>
    %5 = vector.extract_strided_slice %4 {offsets = [0, 0], sizes = [7, 15], strides = [1, 1]} : vector<7x16xf32> to vector<7x15xf32>
    %6 = vector.extract_strided_slice %4 {offsets = [0, 1], sizes = [7, 15], strides = [1, 1]} : vector<7x16xf32> to vector<7x15xf32>
    %7 = arith.addf %5, %6 : vector<7x15xf32>
    %8 = vector.extract_strided_slice %7 {offsets = [0, 0], sizes = [7, 15], strides = [1, 1]} : vector<7x15xf32> to vector<7x15xf32>
    %cst = arith.constant 2.500000e-01 : f32
    %9 = vector.broadcast %cst : f32 to vector<7x15xf32>
    %10 = arith.mulf %8, %9 : vector<7x15xf32>
    %c0_1 = arith.constant 0 : index
    %c0_2 = arith.constant 0 : index
    %11 = vector.load %arg3[%c0_1, %c0_2] : memref<8x15xf32, #tpu.memory_space<vmem>>, vector<7x15xf32>
    tpu.vector_store %arg3[%c0_1, %c0_2], %10 {strides = array<i32>} : memref<8x15xf32, #tpu.memory_space<vmem>>, vector<7x15xf32>,
    %c0_3 = arith.constant 0 : index
    %c0_4 = arith.constant 0 : index
    %12 = vector.load %arg1[%c0_3, %c0_4] : memref<8x16xf32, #tpu.memory_space<vmem>>, vector<8x16xf32>
    %c0_5 = arith.constant 0 : index
    %c0_6 = arith.constant 0 : index
    %13 = vector.load %arg4[%c0_5, %c0_6] : memref<16x16xf32, #tpu.memory_space<vmem>>, vector<8x16xf32>
    tpu.vector_store %arg4[%c0_5, %c0_6], %12 {strides = array<i32>} : memref<16x16xf32, #tpu.memory_space<vmem>>, vector<8x16xf32>,
    %c0_7 = arith.constant 0 : index
    %c0_8 = arith.constant 0 : index
    %14 = vector.load %arg2[%c0_7, %c0_8] : memref<8x16xf32, #tpu.memory_space<vmem>>, vector<8x16xf32>
    %c8 = arith.constant 8 : index
    %c0_9 = arith.constant 0 : index
    %15 = vector.load %arg4[%c8, %c0_9] : memref<16x16xf32, #tpu.memory_space<vmem>>, vector<8x16xf32>
    tpu.vector_store %arg4[%c8, %c0_9], %14 {strides = array<i32>} : memref<16x16xf32, #tpu.memory_space<vmem>>, vector<8x16xf32>,
    %c0_10 = arith.constant 0 : index
    %c0_11 = arith.constant 0 : index
    %16 = vector.load %arg4[%c0_10, %c0_11] : memref<16x16xf32, #tpu.memory_space<vmem>>, vector<16x16xf32>
    %17 = vector.extract_strided_slice %16 {offsets = [0, 0], sizes = [15, 16], strides = [1, 1]} : vector<16x16xf32> to vector<15x16xf32>
    %18 = vector.extract_strided_slice %16 {offsets = [1, 0], sizes = [15, 16], strides = [1, 1]} : vector<16x16xf32> to vector<15x16xf32>
    %19 = arith.addf %17, %18 : vector<15x16xf32>
    %20 = vector.extract_strided_slice %19 {offsets = [0, 0], sizes = [15, 16], strides = [1, 1]} : vector<15x16xf32> to vector<15x16xf32>
    %21 = vector.extract_strided_slice %20 {offsets = [0, 0], sizes = [15, 15], strides = [1, 1]} : vector<15x16xf32> to vector<15x15xf32>
    %22 = vector.extract_strided_slice %20 {offsets = [0, 1], sizes = [15, 15], strides = [1, 1]} : vector<15x16xf32> to vector<15x15xf32>
    %23 = arith.addf %21, %22 : vector<15x15xf32>
    %24 = vector.extract_strided_slice %23 {offsets = [0, 0], sizes = [15, 15], strides = [1, 1]} : vector<15x15xf32> to vector<15x15xf32>
    %cst_12 = arith.constant 2.500000e-01 : f32
    %25 = vector.broadcast %cst_12 : f32 to vector<15x15xf32>
    %26 = arith.mulf %24, %25 : vector<15x15xf32>
    %27 = vector.extract_strided_slice %26 {offsets = [0, 0], sizes = [8, 15], strides = [1, 1]} : vector<15x15xf32> to vector<8x15xf32>
    %c0_13 = arith.constant 0 : index
    %c0_14 = arith.constant 0 : index
    %28 = vector.load %arg3[%c0_13, %c0_14] : memref<8x15xf32, #tpu.memory_space<vmem>>, vector<8x15xf32>
    tpu.vector_store %arg3[%c0_13, %c0_14], %27 {strides = array<i32>} : memref<8x15xf32, #tpu.memory_space<vmem>>, vector<8x15xf32>,
    return
  }
  func.func @transform_0(%arg0: i32) -> (i32, i32) {
    %c0_i32 = arith.constant 0 : i32
    %c0_i32_0 = arith.constant 0 : i32
    return %arg0, %c0_i32 : i32, i32
  }
  func.func @transform_1(%arg0: i32) -> (i32, i32) {
    %c1_i32 = arith.constant 1 : i32
    %0 = arith.addi %arg0, %c1_i32 : i32
    %c1_i32_0 = arith.constant 1 : i32
    %1 = arith.muli %0, %c1_i32_0 : i32
    %c1_i32_1 = arith.constant 1 : i32
    %2 = arith.minsi %1, %c1_i32_1 : i32
    %c0_i32 = arith.constant 0 : i32
    %c0_i32_2 = arith.constant 0 : i32
    return %2, %c0_i32 : i32, i32
  }
  func.func @transform_2(%arg0: i32) -> (i32, i32) {
    %c0_i32 = arith.constant 0 : i32
    %c0_i32_0 = arith.constant 0 : i32
    return %arg0, %c0_i32 : i32, i32
  }
}

</mosaic_0001>

<bundles_post_ra>
// kernel: tpu_custom_call.1
= control target key start
LH: loop header
LB: loop body
LE: loop exit
PB: predicated region body
PF: predicated region fallthrough
CT: control target
= control target key end

     0   :  { %s839_s0 = inlined_call_operand.hbm [shape: f32[16,16], index: 0, kind: input, shape index: {}]   ;;  %s840_s1 = inlined_call_operand.hbm [shape: f32[16,16], index: 1, kind: input, shape index: {}]   ;;  %s841_s2 = inlined_call_operand.hbm [shape: f32[15,15], index: 2, kind: output, shape index: {}]  }
   0x1   :  { %845 = sst [smem:[#allocation13_spill]] %s839_s0 }
   0x2   :  { %7 = vsyncpa [#allocation4], 0 }
   0x3   :  { %9 = vsyncpa [#allocation4 + $0x1], 0 }
   0x4   :  { %10 = vsyncpa [#allocation7], 0 }
   0x5   :  { %12 = vsyncpa [#allocation7 + $0x1], 0 }
   0x6   :  { %13 = vsyncpa [#allocation5], 0 }
   0x7   :  { %15 = vsyncpa [#allocation5 + $0x1], 0  ;;  %s620_s9 = smov 0   ;;  %s622_s10 = smov 0  }
   0x8   :  { %s624_s11 = smov 0   ;;  %s626_s12 = smov 0  }
   0x9   :  { %s628_s13 = smov 0   ;;  %s630_s14 = smov 0  }
   0xa   :  { %s632_s15 = smov 0  }
   0xb LB: > { %s656_s16 = sadd.s32 4294967295, %s602_s15   ;;  %s357_s17 = sadd.s32 4294967294, %s602_s15   ;;  %s602_s15 = sphi %s632_s15, %s868_s15   ;;  %s598_s14 = sphi %s630_s14, %s867_s14   ;;  %s594_s13 = sphi %s628_s13, %s866_s13   ;;  %s590_s12 = sphi %s626_s12, %s865_s12   ;;  %s586_s11 = sphi %s624_s11, %s864_s11   ;;  %s582_s10 = sphi %s622_s10, %s863_s10   ;;  %s578_s9 = sphi %s620_s9, %s862_s9  }
   0xc   : > { %s28_s18 = sadd.s32 1, %s598_s14  ;;  %p35_p0 = scmp.ne.s32.totalorder %s598_s14, %s594_s13 }
   0xd   : > { %p844_p1 = scmp.eq.s32.totalorder %s602_s15, 0  ;;  %p41_p2 = scmp.ne.s32.totalorder %s594_s13, %s590_s12 }
   0xe   : > { %p843_p3 = scmp.eq.s32.totalorder %s656_s16, 0  ;;  %p97_p4 = scmp.eq.s32.totalorder %s656_s16, 1 }
   0xf   : > { %p669_p5 = por %p844_p1, %p35_p0  ;;  %p103_p6 = scmp.eq.s32.totalorder %s357_s17, 1 }
  0x10   : > { %p675_p7 = por %p843_p3, %p41_p2  ;;  %p679_p8 = por %p97_p4, %p35_p0 }
  0x11   : > { %p683_p9 = por %p103_p6, %p41_p2  ;;  %p842_p11 = scmp.lt.s32.totalorder %s602_s15, 2 }
  0x12   : > { %s123_s23 = sand.u32 1, %s598_s14   ;;  %s361_s25 = sshll.u32 %s602_s15, 3 }
  0x13   : > { %s360_s24 = sshll.u32 %s123_s23, 3  ;;  %s850_s0 = sld [smem:[#allocation13_spill]] }
  0x14   : > { %s127_s29 = scalar_lea.vmem [#allocation3], %s360_s24  ;;  %p698_p12 = pnand %p842_p11, %p669_p5 }
  0x15   : > { %s135_s30 = sshll.u32 %s127_s29, 4  ;;  %p364_p13 = scmp.ge.s32.totalorder %s602_s15, 1  ;;  %s136_s30 = int_to_ptr.vmem [resolvable:$true] %s135_s30 }
  0x16   : > { %p162_p0 = scmp.lt.s32.totalorder %s602_s15, 3  ;;  %s124_s5 = scalar_lea.sflag [#allocation4], %s123_s23 }
  0x17   : > { %p452_p4 = pneg %p698_p12 }
  0x19   : > { %s131_s28 = scalar_lea.hbm %s850_s0, %s361_s25  ;;  %s455_s19 = scalar_lea.hbm %s850_s0, 16 }
  0x1a   : > { %s133_s3 = sshll.u32 %s131_s28, 4  ;;  %s134_s3 = int_to_ptr.hbm [resolvable:$true] %s133_s3 }
  0x1b   : > { %s448_s6 = sshra.s32 %s134_s3, 4  ;;  %s449_s6 = int_to_ptr.hbm [resolvable:$true] %s448_s6 }
  0x1c   : > { %s450_s7 = scalar_lea.hbm %s449_s6, 8  ;;  %p456_p5 = scmp.lt.s32.totalorder %s449_s6, %s850_s0 }
  0x1d   : > { %p451_p2 = scmp.ne.s32.totalorder %s449_s6, %s450_s7  ;;  %p457_p11 = scmp.lt.s32.totalorder %s455_s19, %s450_s7 }
  0x1f   : > { %p453_p6 = pnand %p452_p4, %p451_p2  ;;  %p458_p3 = por %p457_p11, %p456_p5 }
  0x21   : > { %p454_p10 = pneg %p453_p6 }
  0x23   : > { %p459_p1 = pnand %p458_p3, %p454_p10 }
  0x25   : > { %462 = shalt.err (!%p459_p1)
}
  0x26   : > { %381 = dma.hbm_to_vmem [thread:$0]  (!%p698_p12), %s134_s3, 128, %s136_s30, %s124_s5  }
  0x27   : > { %p718_p1 = pnand %p364_p13, %p162_p0  ;;  %s723_s26 = sadd.s32 1, %s602_s15  }
  0x28   : > { %s60_s27 = sadd.s32 1, %s586_s11  ;;  %s25_s28 = ssub.s32 %s602_s15, %s723_s26 }
  0x29   : > { %p52_p3 = scmp.lt.s32.totalorder %s723_s26, 1  ;;  %p26_p10 = scmp.eq.s32.totalorder %s25_s28, 0 }
  0x2a   : > { %s54_s29 = sadd.s32 1, %s723_s26  ;;  %p67_p12 = scmp.ne.s32.totalorder %s586_s11, %s582_s10 }
  0x2b   : > { %s53_s30 = scalar_select %p52_p3, %s723_s26, 1 }
  0x2c   : > { %s734_s3 = scalar_select %p26_p10, %s598_s14, %s28_s18  }
  0x2d   : > { %p55_p11 = scmp.lt.s32.totalorder %s54_s29, 1  ;;  %p73_p13 = scmp.ne.s32.totalorder %s582_s10, %s578_s9 }
  0x2e   : > { %853 = sst [smem:[#allocation12_spill]] %s734_s3  ;;  %s142_s4 = sand.u32 1, %s586_s11  }
  0x2f   : > { %s870_s29 = smov (!%p55_p11, %s54_s29), 1  ;;  %p854_p0 = scmp.eq.s32.totalorder %s602_s15, 0 }
  0x30   : > { %p856_p4 = scmp.eq.s32.totalorder %s656_s16, 0  ;;  %s57_s7 = ssub.s32 %s53_s30, %s870_s29 }
  0x31   : > { %p743_p2 = por %p67_p12, %p854_p0  ;;  %p58_p5 = scmp.eq.s32.totalorder %s57_s7, 0 }
  0x32   : > { %p749_p6 = por %p73_p13, %p856_p4  ;;  %s362_s18 = sshll.u32 %s142_s4, 3 }
  0x33   : > { %s363_s8 = sshll.u32 %s53_s30, 3  ;;  %s146_s25 = scalar_lea.vmem [#allocation6], %s362_s18 }
  0x34   : > { %s754_s17 = scalar_select %p58_p5, %s586_s11, %s60_s27  }
  0x35   : > { %s153_s24 = scalar_lea.hbm %s840_s1, %s363_s8  ;;  %s157_s28 = sshll.u32 %s146_s25, 4  ;;  %s158_s28 = int_to_ptr.vmem [resolvable:$true] %s157_s28 }
  0x36   : > { %s155_s0 = sshll.u32 %s153_s24, 4  ;;  %p858_p3 = scmp.lt.s32.totalorder %s602_s15, 2  ;;  %s156_s0 = int_to_ptr.hbm [resolvable:$true] %s155_s0 }
  0x37   : > { %s143_s29 = scalar_lea.sflag [#allocation7], %s142_s4  ;;  %s478_s30 = sshra.s32 %s156_s0, 4  ;;  %s479_s30 = int_to_ptr.hbm [resolvable:$true] %s478_s30 }
  0x38   : > { %p763_p10 = pnand %p858_p3, %p743_p2  ;;  %s480_s27 = scalar_lea.hbm %s479_s30, 8 }
  0x39   : > { %p481_p11 = scmp.ne.s32.totalorder %s479_s30, %s480_s27  ;;  %s485_s8 = scalar_lea.hbm %s840_s1, 16 }
  0x3a   : > { %p482_p12 = pneg %p763_p10  ;;  %p486_p2 = scmp.lt.s32.totalorder %s479_s30, %s840_s1 }
  0x3b   : > { %p487_p4 = scmp.lt.s32.totalorder %s485_s8, %s480_s27 }
  0x3c   : > { %p483_p13 = pnand %p482_p12, %p481_p11 }
  0x3d   : > { %p488_p5 = por %p487_p4, %p486_p2 }
  0x3e   : > { %p484_p0 = pneg %p483_p13 }
  0x40   : > { %p489_p3 = pnand %p488_p5, %p484_p0 }
  0x42   : > { %492 = shalt.err (!%p489_p3)
}
  0x43   : > { %384 = dma.hbm_to_vmem [thread:$0]  (!%p763_p10), %s156_s0, 128, %s158_s28, %s143_s29  }
  0x44   : > { %166 = sbr.rel (%p718_p1) target bundleno = 215 (0xd7), region = 28  ;;  %s780_s4 = sand.u32 (!%p718_p1), 1, %s594_s13  }
  0x45   : > { %s365_s19 = sshll.u32 (!%p718_p1), %s780_s4, 3  ;;  %s169_s24 = scalar_lea.sflag (!%p718_p1), [#allocation4], %s780_s4 }
  0x46   : > { %s172_s25 = scalar_lea.vmem (!%p718_p1), [#allocation3], %s365_s19 }
  0x49   : > { %565 = dma.done.wait (%p675_p7), %s169_s24, 128  }
  0x4a   : > { %567 = vsyncadd (%p675_p7), %s169_s24, 4294967168  ;;  %s178_s0 = sand.u32 1, %s582_s10  }
  0x4b   : > { %s366_s23 = sshll.u32 %s178_s0, 3  ;;  %s179_s3 = scalar_lea.sflag [#allocation7], %s178_s0 }
  0x4c   : > { %s182_s28 = scalar_lea.vmem [#allocation6], %s366_s23 }
  0x4d   : > { %569 = dma.done.wait (%p749_p6), %s179_s3, 128  }
  0x4e   : > { %571 = vsyncadd (%p749_p6), %s179_s3, 4294967168  ;;  %vm226_vm0 = vcmask 130048   ;;  %v225_v0 = vld [vmem:[%s172_s25] sm:$0xff]  ;;  %v228_v1 = vld [vmem:[%s182_s28] sm:$0xff]  ;;  %s604_s20 = smov 127   ;;  %vm234_vm1 = vcmask 1046528  }
  0x4f   : > { %227 = vst.msk [vmem:[#allocation2] sm:$0xff] %vm226_vm0, %v225_v0  ;;  %v214_v2 = vrot.slane %v225_v0, 1  ;;  %vm223_vm2 = vcmask 120832   ;;  %s369_s6 = sshll.u32 %s656_s16, 3  ;;  %s208_s29 = scalar_lea.vmem [#allocation8], %s365_s19  ;;  %vm246_vm3 = vcmask 121856  }
  0x50   : > { %229 = vst.msk [vmem:[#allocation2 + $0x8] sm:$0xff] %vm226_vm0, %v228_v1  ;;  %s259_s7 = scalar_lea.hbm %s841_s2, %s369_s6  ;;  %s261_s18 = sshll.u32 %s208_s29, 4  ;;  %s262_s18 = int_to_ptr.vmem [resolvable:$true] %s261_s18 }
  0x51   : > { %v216_v3 = vadd.f32 %v225_v0, %v214_v2  ;;  %s263_s8 = sshll.u32 %s259_s7, 4  ;;  %s249_s5 = scalar_lea.sflag [#allocation5], %s780_s4  ;;  %s264_s8 = int_to_ptr.hbm [resolvable:$true] %s263_s8 }
  0x52   : > { %s522_s9 = sshra.s32 %s264_s8, 4  ;;  %s528_s25 = scalar_lea.hbm %s841_s2, 16  ;;  %s523_s9 = int_to_ptr.hbm [resolvable:$true] %s522_s9 }
  0x53   : > { %218 = vrot.lane.b32.xlu0 %v216_v3, %s604_s20  ;;  %s524_s16 = scalar_lea.hbm %s523_s9, 8  ;;  %p529_p10 = scmp.lt.s32.totalorder %s523_s9, %s841_s2 }
  0x54   : > { %p525_p7 = scmp.ne.s32.totalorder %s523_s9, %s524_s16  ;;  %p530_p11 = scmp.lt.s32.totalorder %s528_s25, %s524_s16 }
  0x56   : > { %v230_v4 = vld [vmem:[#allocation2] sm:$0xff]  ;;  %p526_p1 = pnand %p525_p7, %p679_p8  ;;  %p531_p12 = por %p530_p11, %p529_p10 }
  0x57   : > { %v231_v5 = vld [vmem:[#allocation2 + $0x8] sm:$0xff]  ;;  %v235_v6 = vrot.slane %v230_v4, 1 }
  0x58   : > { %v236_v7 = vrot.slane %v231_v5, 1  ;;  %p527_p6 = pneg %p526_p1 }
  0x5a   : > { %v237_v8 = vsel %vm234_vm1, %v235_v6, %v236_v7  ;;  %p532_p13 = pnand %p531_p12, %p527_p6 }
  0x5b   : > { %v239_v9 = vadd.f32 %v237_v8, %v230_v4 }
  0x5d   : > { %241 = vrot.lane.b32.xlu0 %v239_v9, %s604_s20 }
  0xc5   : > { %v219_v10 = vpop.permute.xlu0 %218 }
  0xc6   : > { %v221_v11 = vadd.f32 %v219_v10, %v216_v3 }
  0xc8   : > { %v222_v12 = vmul.f32 0.25, %v221_v11 }
  0xca   : > { %224 = vst.msk [vmem:[%s208_s29] sm:$0x7f] %vm223_vm2, %v222_v12 }
  0xcf   : > { %v242_v13 = vpop.permute.xlu0 %241 }
  0xd0   : > { %v244_v14 = vadd.f32 %v242_v13, %v239_v9 }
  0xd2   : > { %v245_v15 = vmul.f32 0.25, %v244_v14 }
  0xd4   : > { %247 = vst.msk [vmem:[%s208_s29] sm:$0xff] %vm246_vm3, %v245_v15 }
  0xd5   : > { %535 = shalt.err (!%p532_p13)
}
  0xd6   : > { %376 = dma.vmem_to_hbm [thread:$0]  (%p679_p8), %s262_s18, 128, %s264_s8, %s249_s5  }
  0xd7 PF: > { %s275_s4 = sand.u32 1, %s590_s12   ;;  %p860_p0 = scmp.ge.s32.totalorder %s602_s15, 2 }
  0xd8   : > { %s276_s3 = scalar_lea.sflag [#allocation5], %s275_s4 }
  0xd9   : > { %p386_p2 = pnand %p860_p0, %p683_p9 }
  0xdb   : > { %p387_p4 = pneg %p386_p2 }
  0xdd   : > { %573 = dma.done.wait (%p387_p4), %s276_s3, 128  }
  0xde   : > { %575 = vsyncadd (%p387_p4), %s276_s3, 4294967168  ;;  %s861_s21 = sld [smem:[#allocation12_spill]]  ;;  %p18_p8 = scmp.ge.s32.totalorder %s723_s26, 4  }
  0xdf   : > { %s862_s9 = smov %s582_s10  ;;  %s863_s10 = smov %s586_s11 }
  0xe0   : > { %s864_s11 = smov %s754_s17  ;;  %s865_s12 = smov %s594_s13 }
  0xe1   : > { %s866_s13 = smov %s598_s14  ;;  %s868_s15 = smov %s723_s26 }
  0xe2   :  { %20 = sbr.rel (!%p18_p8) target bundleno = 11 (0xb), region = 86 }
  0xe4   : > { %s867_s14 = smov %s861_s21 }
  0xe7   :  { %282 = vsyncpa [#allocation4], 1 }
  0xe8   :  { %284 = vsyncpa [#allocation4 + $0x1], 1 }
  0xe9   :  { %285 = vsyncpa [#allocation7], 1 }
  0xea   :  { %287 = vsyncpa [#allocation7 + $0x1], 1 }
  0xeb   :  { %288 = vsyncpa [#allocation5], 1 }
  0xec   :  { %290 = vsyncpa [#allocation5 + $0x1], 1 }

</bundles_post_ra>
